<compile_context>
chip_gen: v7x
topology: tpu7x:2x2x1
jax: 0.10.0
libtpu: 0.0.40
codegen_flags: <defaults>
</compile_context>

<pallas_src>
import functools

import jax
import jax.numpy as jnp
from jax.experimental import pallas as pl
from jax.experimental.pallas import tpu as pltpu


# MXU operand dtype; accumulation is always f32.
COMPUTE_DTYPE = jnp.bfloat16

# Per-grid-step VMEM budget used to size the attention head-group.  Kept well
# under v7x's 64 MiB physical VMEM (and the 16/32 MiB default scoped limits
# once double-buffering headroom is added on top).
_ATTN_VMEM_BUDGET = 24 * 1024 * 1024


# ---------------------------------------------------------------------------
# Tiled linear (matmul + bias) kernels
# ---------------------------------------------------------------------------
def _linear_kernel_single_k(x_ref, w_ref, b_ref, o_ref):
    # No contraction grid axis: write directly (no f32 scratch, no pl.when).
    o_ref[...] = (
        jnp.dot(x_ref[...], w_ref[...], preferred_element_type=jnp.float32)
        + b_ref[...]
    ).astype(o_ref.dtype)


def _linear_kernel_multi_k(x_ref, w_ref, b_ref, o_ref, acc_ref):
    @pl.when(pl.program_id(2) == 0)
    def _init():
        acc_ref[...] = jnp.zeros_like(acc_ref)

    acc_ref[...] += jnp.dot(
        x_ref[...], w_ref[...], preferred_element_type=jnp.float32
    )

    @pl.when(pl.program_id(2) == pl.num_programs(2) - 1)
    def _finalize():
        # Bias added once, on the f32 accumulator, at the last K step.
        o_ref[...] = (acc_ref[...] + b_ref[...]).astype(o_ref.dtype)


def _pick_tile(dim, cap, aligns):
    """Largest tile <= cap dividing `dim`, preferring larger alignments.

    Alignments are tried in order (256 first to fill the v6e/v7x MXU pass,
    then the fallback).  Returns the full dim when dim <= cap.
    # TODO(synk): add a remainder/masking path instead of the full-dim
    # fallback for pathological non-divisible shapes.
    """
    if dim <= cap:
        return dim
    for align in aligns:
        tile = (cap // align) * align
        while tile >= align:
            if dim % tile == 0:
                return tile
            tile -= align
    return dim


def pallas_linear(x2d, w, b, *, out_dtype=jnp.float32,
                  tm_cap=512, tn_cap=512, tk_cap=512):
    """x2d: (M, Din), w: (Din, Dout), b: (Dout,) -> (M, Dout) in out_dtype."""
    M, Kin = x2d.shape
    Kin2, N = w.shape
    assert Kin == Kin2
    tm = _pick_tile(M, tm_cap, (256, 8))
    tn = _pick_tile(N, tn_cap, (256, 128))
    tk = _pick_tile(Kin, tk_cap, (256, 128))

    x2d = x2d.astype(COMPUTE_DTYPE)
    w = w.astype(COMPUTE_DTYPE)
    b2d = b.reshape(1, N).astype(jnp.float32)

    nk = Kin // tk
    if nk == 1:
        return pl.pallas_call(
            _linear_kernel_single_k,
            out_shape=jax.ShapeDtypeStruct((M, N), out_dtype),
            grid_spec=pltpu.PrefetchScalarGridSpec(
                num_scalar_prefetch=0,
                grid=(M // tm, N // tn),
                in_specs=[
                    pl.BlockSpec((tm, Kin), lambda i, j: (i, 0)),
                    pl.BlockSpec((Kin, tn), lambda i, j: (0, j)),
                    pl.BlockSpec((1, tn), lambda i, j: (0, j)),
                ],
                out_specs=pl.BlockSpec((tm, tn), lambda i, j: (i, j)),
            ),
            compiler_params=pltpu.CompilerParams(
                dimension_semantics=("parallel", "parallel")),
        )(x2d, w, b2d)

    return pl.pallas_call(
        _linear_kernel_multi_k,
        out_shape=jax.ShapeDtypeStruct((M, N), out_dtype),
        grid_spec=pltpu.PrefetchScalarGridSpec(
            num_scalar_prefetch=0,
            grid=(M // tm, N // tn, nk),
            in_specs=[
                pl.BlockSpec((tm, tk), lambda i, j, kk: (i, kk)),
                pl.BlockSpec((tk, tn), lambda i, j, kk: (kk, j)),
                pl.BlockSpec((1, tn), lambda i, j, kk: (0, j)),
            ],
            out_specs=pl.BlockSpec((tm, tn), lambda i, j, kk: (i, j)),
            scratch_shapes=[pltpu.VMEM((tm, tn), jnp.float32)],
        ),
        compiler_params=pltpu.CompilerParams(
            dimension_semantics=("parallel", "parallel", "arbitrary")),
    )(x2d, w, b2d)


# ---------------------------------------------------------------------------
# Attention + fused output projection
# ---------------------------------------------------------------------------
def _attn_fc_kernel(qkv_ref, fcw_ref, fcb_ref, o_ref, *scratch, scale, hg):
    """One (batch item, head-group) grid step.

    qkv_ref: (1, 3, hg, t, k)  bf16  — q/k/v for `hg` heads of one batch item.
    fcw_ref: (hg, k, k_out)    bf16  — matching slice of the output projection.
    fcb_ref: (1, k_out)        f32
    o_ref:   (1, t, k_out)
    scratch: optional (t, k_out) f32 accumulator, present iff the head axis
             is split into more than one head-group (reduction over groups).
    """
    multi_group = len(scratch) == 1

    acc = None
    # hg is small and static; unrolled.  (For large t, replace the per-head
    # dense (t, t) softmax with flash tiling over KV blocks.)
    for hi in range(hg):
        q = qkv_ref[0, 0, hi] * scale      # (t, k); fold 1/sqrt(k) into Q
        kk = qkv_ref[0, 1, hi]             # (t, k)
        v = qkv_ref[0, 2, hi]              # (t, k)

        # scores[i, j] = sum_d kk[i, d] * q[j, d]  (== K @ Q^T, no transpose)
        scores = jax.lax.dot_general(
            kk, q, dimension_numbers=(((1,), (1,)), ((), ())),
            preferred_element_type=jnp.float32)            # (t, t) f32

        m = jnp.max(scores, axis=-1, keepdims=True)
        e = jnp.exp(scores - m)                            # EUP
        denom = jnp.sum(e, axis=-1, keepdims=True)         # XLU reduce

        # Unnormalized PV matmul first; normalize the small (t, k) result
        # afterwards (t*k VALU multiplies instead of t*t).
        out = jax.lax.dot_general(
            e.astype(COMPUTE_DTYPE), v,
            dimension_numbers=(((1,), (0,)), ((), ())),
            preferred_element_type=jnp.float32)            # (t, k) f32
        out = out * pl.reciprocal(denom, approx=True)      # EUP recip

        # Fused output-projection contribution of this head.
        contrib = jax.lax.dot_general(
            out.astype(COMPUTE_DTYPE), fcw_ref[hi],
            dimension_numbers=(((1,), (0,)), ((), ())),
            preferred_element_type=jnp.float32)            # (t, k_out) f32
        acc = contrib if acc is None else acc + contrib

    if multi_group:
        acc_ref = scratch[0]

        @pl.when(pl.program_id(1) == 0)
        def _init():
            acc_ref[...] = jnp.zeros_like(acc_ref)

        acc_ref[...] += acc

        @pl.when(pl.program_id(1) == pl.num_programs(1) - 1)
        def _finalize():
            o_ref[0] = (acc_ref[...] + fcb_ref[...]).astype(o_ref.dtype)
    else:
        o_ref[0] = (acc + fcb_ref[...]).astype(o_ref.dtype)


def _pick_head_group(h, t, k, k_out, budget_bytes):
    """Largest divisor of h whose per-step VMEM estimate fits the budget."""
    def est(hg):
        temps = hg * t * t * (4 + 4 + 2)           # scores f32 + e f32 + e bf16
        temps += hg * t * k * 4                    # unnormalized PV output f32
        bufs = 2 * (3 * hg * t * k * 2             # double-buffered qkv block
                    + hg * k * k_out * 2)          # double-buffered fc_w block
        outs = 2 * t * k_out * 4 + t * k_out * 4   # output block + accumulator
        return temps + bufs + outs

    candidates = [g for g in range(h, 0, -1) if h % g == 0]
    for g in candidates:
        if est(g) <= budget_bytes:
            return g, est(g)
    g = candidates[-1]
    return g, est(g)


def pallas_attention_fc(qkv_hm, fcw3, fcb2, *, feat_k, out_dtype=jnp.float32):
    """qkv_hm: (b, 3, h, t, k) bf16; fcw3: (h, k, k_out); fcb2: (1, k_out).

    Returns (b, t, k_out) = fc(concat_heads(softmax(K Q^T / sqrt(k)) V)).
    """
    b, three, h, t, k = qkv_hm.shape
    assert three == 3 and feat_k == k
    k_out = fcw3.shape[-1]

    hg, est_bytes = _pick_head_group(h, t, k, k_out, _ATTN_VMEM_BUDGET)
    ng = h // hg
    scale = 1.0 / (feat_k ** 0.5)

    scratch_shapes = [] if ng == 1 else [pltpu.VMEM((t, k_out), jnp.float32)]
    # Generous vs. the estimate, but below v7x's 64 MiB physical VMEM; raises
    # the 16/32 MiB default scoped limits on v5e/v6e when actually needed.
    vmem_limit = int(min(max(2 * est_bytes, 16 * 1024 * 1024),
                         56 * 1024 * 1024))

    return pl.pallas_call(
        functools.partial(_attn_fc_kernel, scale=scale, hg=hg),
        out_shape=jax.ShapeDtypeStruct((b, t, k_out), out_dtype),
        grid_spec=pltpu.PrefetchScalarGridSpec(
            num_scalar_prefetch=0,
            grid=(b, ng),
            in_specs=[
                pl.BlockSpec((1, 3, hg, t, k),
                             lambda bi, gi: (bi, 0, gi, 0, 0)),
                pl.BlockSpec((hg, k, k_out), lambda bi, gi: (gi, 0, 0)),
                pl.BlockSpec((1, k_out), lambda bi, gi: (0, 0)),
            ],
            out_specs=pl.BlockSpec((1, t, k_out), lambda bi, gi: (bi, 0, 0)),
            scratch_shapes=scratch_shapes,
        ),
        compiler_params=pltpu.CompilerParams(
            dimension_semantics=("parallel", "arbitrary"),
            vmem_limit_bytes=vmem_limit,
        ),
    )(qkv_hm, fcw3, fcb2)


# ---------------------------------------------------------------------------
# Full forward pass (mirrors Thiccatten.forward)
# ---------------------------------------------------------------------------
def thiccatten_forward(x, params, heads):
    b, t, k = x.shape
    h = heads

    # Fused Q/K/V projection: one kernel launch, one pass over x,
    # lane-dense (b*t, 3*h*k) bf16 output.
    w_qkv = jnp.concatenate(
        [params["qw_w"], params["kw_w"], params["vw_w"]], axis=1)
    b_qkv = jnp.concatenate(
        [params["qw_b"], params["kw_b"], params["vw_b"]], axis=0)
    qkv = pallas_linear(x.reshape(b * t, k), w_qkv, b_qkv,
                        out_dtype=COMPUTE_DTYPE)           # (b*t, 3*h*k)

    # (b*t, 3hk) -> (b, t, 3, h, k) is a pure reshape; a single fused XLA
    # copy then moves it to head-major (b, 3, h, t, k) so the attention+fc
    # kernel only ever integer-indexes leading block dims.  This replaces the
    # 3 head-split transposes, the head-merge transpose and the separate fc
    # matmul HBM pass of the naive formulation.
    qkv_hm = jnp.transpose(qkv.reshape(b, t, 3, h, k), (0, 2, 3, 1, 4))

    fcw3 = params["fc_w"].reshape(h, k, k).astype(COMPUTE_DTYPE)  # (h, k, k_out)
    fcb2 = params["fc_b"].reshape(1, k).astype(jnp.float32)
    return pallas_attention_fc(qkv_hm, fcw3, fcb2,
                               feat_k=k, out_dtype=jnp.float32)   # (b, t, k)


# ---------------------------------------------------------------------------
# Pure-JAX f32 reference for a correctness check
# ---------------------------------------------------------------------------
def thiccatten_ref(x, params, heads):
    b, t, k = x.shape
    h = heads
    x2d = x.reshape(b * t, k)
    q = (x2d @ params["qw_w"] + params["qw_b"]).reshape(b, t, h, k)
    key = (x2d @ params["kw_w"] + params["kw_b"]).reshape(b, t, h, k)
    v = (x2d @ params["vw_w"] + params["vw_b"]).reshape(b, t, h, k)
    q3 = q.transpose(0, 2, 1, 3).reshape(b * h, t, k) / (k ** 0.25)
    k3 = key.transpose(0, 2, 1, 3).reshape(b * h, t, k) / (k ** 0.25)
    v3 = v.transpose(0, 2, 1, 3).reshape(b * h, t, k)
    dot = jnp.einsum("bik,bjk->bij", k3, q3)
    p = jax.nn.softmax(dot, axis=2)
    out = jnp.einsum("bij,bjk->bik", p, v3)
    out = out.reshape(b, h, t, k).transpose(0, 2, 1, 3).reshape(b * t, h * k)
    return (out @ params["fc_w"] + params["fc_b"]).reshape(b, t, k)


# ---------------------------------------------------------------------------
# Deterministic parameter init (PyTorch-Linear-style uniform bounds)
# ---------------------------------------------------------------------------
def init_params(key, k, heads):
    kh = k * heads
    keys = jax.random.split(key, 8)

    def lin_init(wkey, bkey, din, dout):
        bound = 1.0 / (din ** 0.5)
        w = jax.random.uniform(wkey, (din, dout), jnp.float32, -bound, bound)
        b = jax.random.uniform(bkey, (dout,), jnp.float32, -bound, bound)
        return w, b

    qw_w, qw_b = lin_init(keys[0], keys[1], k, kh)
    kw_w, kw_b = lin_init(keys[2], keys[3], k, kh)
    vw_w, vw_b = lin_init(keys[4], keys[5], k, kh)
    fc_w, fc_b = lin_init(keys[6], keys[7], kh, k)
    return dict(
        qw_w=qw_w, qw_b=qw_b,
        kw_w=kw_w, kw_b=kw_b,
        vw_w=vw_w, vw_b=vw_b,
        fc_w=fc_w, fc_b=fc_b,
    )


if __name__ == "__main__":
    # Small shapes consistent with the module: (b, t, k) = (2, 8, 32), heads=4
    B, T, K, HEADS = 2, 8, 32, 4

    root = jax.random.PRNGKey(0)
    pkey, xkey = jax.random.split(root)
    params = init_params(pkey, K, HEADS)
    x = jax.random.normal(xkey, (B, T, K), dtype=jnp.float32)

    y = thiccatten_forward(x, params, HEADS)
    y = jax.block_until_ready(y)

    y_ref = thiccatten_ref(x, params, HEADS)
    assert y.shape == (B, T, K)
    # Tolerance accounts for bf16 MXU operands (f32 accumulation) and the
    # approx EUP reciprocal in the softmax normalization.
    assert jnp.allclose(y, y_ref, rtol=3e-2, atol=3e-2), "mismatch vs reference"

    print("KERNEL_OK")
</pallas_src>

<mosaic_0001>
module attributes {stable_mosaic.version = 11 : i64} {
  func.func @_linear_kernel_single_k(%arg0: i32, %arg1: i32, %arg2: memref<16x32xbf16, #tpu.memory_space<vmem>>, %arg3: memref<32x384xbf16, #tpu.memory_space<vmem>>, %arg4: memref<1x384xf32, #tpu.memory_space<vmem>>, %arg5: memref<16x384xbf16, #tpu.memory_space<vmem>>) attributes {dimension_semantics = [#tpu.dimension_semantics<parallel>, #tpu.dimension_semantics<parallel>], iteration_bounds = array<i64: 1, 1>, scalar_prefetch = 0 : i64, scratch_operands = 0 : i64, tpu.core_type = #tpu.core_type<tc>, window_params = [{transform_indices = @transform_0, window_bounds = array<i64: 16, 32>}, {transform_indices = @transform_1, window_bounds = array<i64: 32, 384>}, {transform_indices = @transform_2, window_bounds = array<i64: 1, 384>}, {transform_indices = @transform_3, window_bounds = array<i64: 16, 384>}]} {
    %c0 = arith.constant 0 : index
    %c0_0 = arith.constant 0 : index
    %0 = vector.load %arg2[%c0, %c0_0] : memref<16x32xbf16, #tpu.memory_space<vmem>>, vector<16x32xbf16>
    %c0_1 = arith.constant 0 : index
    %c0_2 = arith.constant 0 : index
    %1 = vector.load %arg3[%c0_1, %c0_2] : memref<32x384xbf16, #tpu.memory_space<vmem>>, vector<32x384xbf16>
    %cst = arith.constant dense<0.000000e+00> : vector<16x384xf32>
    %2 = tpu.matmul %0, %1, %cst {dimension_numbers = #tpu.dot_dimension_numbers<[1], [0], [0], [1], [0, 0, 1, 1], [], []>} : vector<16x32xbf16>, vector<32x384xbf16>, vector<16x384xf32> -> vector<16x384xf32>
    %c0_3 = arith.constant 0 : index
    %c0_4 = arith.constant 0 : index
    %3 = vector.load %arg4[%c0_3, %c0_4] : memref<1x384xf32, #tpu.memory_space<vmem>>, vector<1x384xf32>
    %4 = vector.broadcast %3 : vector<1x384xf32> to vector<16x384xf32>
    %5 = arith.addf %2, %4 : vector<16x384xf32>
    %6 = arith.truncf %5 : vector<16x384xf32> to vector<16x384xbf16>
    %c0_5 = arith.constant 0 : index
    %c0_6 = arith.constant 0 : index
    %7 = vector.load %arg5[%c0_5, %c0_6] : memref<16x384xbf16, #tpu.memory_space<vmem>>, vector<16x384xbf16>
    tpu.vector_store %arg5[%c0_5, %c0_6], %6 {strides = array<i32>} : memref<16x384xbf16, #tpu.memory_space<vmem>>, vector<16x384xbf16>,
    return
  }
  func.func @transform_0(%arg0: i32, %arg1: i32) -> (i32, i32) {
    %c0_i32 = arith.constant 0 : i32
    %c0_i32_0 = arith.constant 0 : i32
    return %arg0, %c0_i32 : i32, i32
  }
  func.func @transform_1(%arg0: i32, %arg1: i32) -> (i32, i32) {
    %c0_i32 = arith.constant 0 : i32
    %c0_i32_0 = arith.constant 0 : i32
    return %c0_i32, %arg1 : i32, i32
  }
  func.func @transform_2(%arg0: i32, %arg1: i32) -> (i32, i32) {
    %c0_i32 = arith.constant 0 : i32
    %c0_i32_0 = arith.constant 0 : i32
    return %c0_i32, %arg1 : i32, i32
  }
  func.func @transform_3(%arg0: i32, %arg1: i32) -> (i32, i32) {
    %c0_i32 = arith.constant 0 : i32
    return %arg0, %arg1 : i32, i32
  }
}

</mosaic_0001>

<bundles_post_ra>
// kernel: tpu_custom_call.1
= control target key start
LH: loop header
LB: loop body
LE: loop exit
PB: predicated region body
PF: predicated region fallthrough
CT: control target
= control target key end

     0   :  { %8 = vsyncpa [#allocation3], 0  ;;  %s432_s0 = inlined_call_operand.hbm [shape: bf16[16,32], index: 0, kind: input, shape index: {}]   ;;  %s433_s1 = inlined_call_operand.hbm [shape: bf16[32,384], index: 1, kind: input, shape index: {}]   ;;  %s434_s2 = inlined_call_operand.vmem [shape: f32[1,384], index: 2, kind: input, shape index: {}]   ;;  %s435_s3 = inlined_call_operand.hbm [shape: bf16[16,384], index: 3, kind: output, shape index: {}]  }
   0x1   :  { %9 = vsyncpa [#allocation6], 0 }
   0x2   :  { %10 = vsyncpa [#allocation4], 0  ;;  %s357_s12 = smov [#allocation2]   ;;  %s285_s16 = scalar_lea.hbm %s432_s0, 128 }
   0x3   :  { %s16_s13 = sshll.u32 %s357_s12, 4  ;;  %p286_p0 = scmp.ne.s32.totalorder %s432_s0, %s285_s16  ;;  %s17_s13 = int_to_ptr.vmem [resolvable:$true] %s16_s13 }
   0x4   :  { %p289_p1 = scmp.lt.u32.totalorder %s285_s16, %s432_s0 }
   0x6   :  { %p291_p2 = pnand %p289_p1, %p286_p0 }
   0x8   :  { %294 = shalt.err (!%p291_p2)
}
   0x9   :  { %s295_s21 = scalar_lea.vmem %s17_s13, 128  ;;  %p300_p4 = scmp.lt.s32.totalorder %s17_s13, %s17_s13 }
   0xa   :  { %p296_p3 = scmp.ne.s32.totalorder %s17_s13, %s295_s21  ;;  %p301_p5 = scmp.lt.s32.totalorder %s295_s21, %s295_s21 }
   0xc   :  { %p302_p6 = por %p301_p5, %p300_p4 }
   0xe   :  { %p303_p7 = pnand %p302_p6, %p296_p3 }
  0x10   :  { %306 = shalt.err (!%p303_p7)
}
  0x11   :  { %s358_s22 = smov 64   ;;  %s359_s23 = smov 4  }
  0x12   :  { %22 = dma.hbm_to_vmem [thread:$0]  %s432_s0, 128, %s17_s13, [#allocation3], %s358_s22, %s358_s22, %s359_s23  }
  0x13   :  { %s360_s26 = smov [#allocation5]   ;;  %s307_s30 = scalar_lea.hbm %s433_s1, 768 }
  0x14   :  { %s28_s27 = sshll.u32 %s360_s26, 4  ;;  %p308_p8 = scmp.ne.s32.totalorder %s433_s1, %s307_s30  ;;  %s29_s27 = int_to_ptr.vmem [resolvable:$true] %s28_s27 }
  0x15   :  { %p311_p9 = scmp.lt.u32.totalorder %s307_s30, %s433_s1 }
  0x17   :  { %p313_p10 = pnand %p311_p9, %p308_p8 }
  0x19   :  { %316 = shalt.err (!%p313_p10)
}
  0x1a   :  { %s317_s8 = scalar_lea.vmem %s29_s27, 768  ;;  %p322_p12 = scmp.lt.s32.totalorder %s29_s27, %s29_s27 }
  0x1b   :  { %p318_p11 = scmp.ne.s32.totalorder %s29_s27, %s317_s8  ;;  %p323_p13 = scmp.lt.s32.totalorder %s317_s8, %s317_s8 }
  0x1d   :  { %p324_p0 = por %p323_p13, %p322_p12 }
  0x1f   :  { %p325_p1 = pnand %p324_p0, %p318_p11 }
  0x21   :  { %328 = shalt.err (!%p325_p1)
}
  0x22   :  { %s361_s0 = smov 192   ;;  %s362_s9 = smov 12  }
  0x23   :  { %34 = dma.hbm_to_vmem [thread:$0]  %s433_s1, 768, %s29_s27, [#allocation6], %s361_s0, %s361_s0, %s362_s9  }
  0x24   :  { %351 = dma.done.wait [#allocation3], 128  }
  0x25   :  { %352 = vsyncadd [#allocation3], 4294967168 }
  0x26   :  { %353 = dma.done.wait [#allocation6], 768  }
  0x27   :  { %354 = vsyncadd [#allocation6], 4294966528  ;;  %v363_v0 = vmov 0.0   ;;  %vm364_vm0 = vmmov 0   ;;  %v365_v1 = vmov 0   ;;  %v284_v8 = vld [vmem:[#allocation2] sm:$0xff]   ;;  %v56_v9 = vlaneseq }
  0x28   :  { %258 = vmatprep.subr.bf16.mxu1 %v363_v0  ;;  %262 = vmatprep.mubr.msk.bf16.mxu1 %vm364_vm0, %v363_v0  ;;  %v276_v2 = vld [vmem:[#allocation5 + $0x4] ss:$12 sps:$4 sm:$0xff]   ;;  %v278_v3 = vld [vmem:[#allocation5 + $0x8] ss:$12 sps:$4 sm:$0xff]   ;;  %v279_v4 = vld [vmem:[#allocation5] ss:$12 sps:$4 sm:$0xff]  }
  0x29   :  { %144 = vmatprep.mubr.bf16.mxu0 %v365_v1  ;;  %112 = vmatprep.subr.bf16.mxu0 %v276_v2  ;;  %v280_v5 = vld [vmem:[#allocation5 + $0x1c] ss:$12 sps:$4 sm:$0xff]   ;;  %v282_v6 = vld [vmem:[#allocation5 + $0x20] ss:$12 sps:$4 sm:$0xff]   ;;  %v283_v7 = vld [vmem:[#allocation5 + $0x18] ss:$12 sps:$4 sm:$0xff]  }
  0x2a   :  { %259 = vmatpush3.bf16.msra.mxu1 %v278_v3  ;;  %113 = vmatpush1.bf16.msra.mxu0 %v279_v4  ;;  %vm108_vm1 = vcmask 261120   ;;  %v57_v10 = vshrl.u32 %v56_v9, 7  ;;  %v54_v12 = vld [vmem:[%s434_s2] sm:$0x7]  ;;  %s366_s2 = smov [#allocation7]  }
  0x2b   :  { %260 = vmatprep.subr.bf16.mxu1 %v363_v0  ;;  %114 = vmatprep.subr.bf16.mxu0 %v280_v5  ;;  %s225_s13 = sshll.u32 %s366_s2, 4  ;;  %s226_s13 = int_to_ptr.vmem [resolvable:$true] %s225_s13 }
  0x2c   :  { %v66_v11 = vsub.s32 2, %v57_v10  ;;  %v58_v13 = vsub.s32 0, %v57_v10  ;;  %v62_v14 = vsub.s32 1, %v57_v10  ;;  %s329_s14 = scalar_lea.vmem %s226_s13, 384  ;;  %p334_p3 = scmp.lt.s32.totalorder %s226_s13, %s226_s13 }
  0x2d   :  { %p330_p2 = scmp.ne.s32.totalorder %s226_s13, %s329_s14  ;;  %p335_p4 = scmp.lt.s32.totalorder %s329_s14, %s329_s14 }
  0x2e   :  { %261 = vmatpush3.bf16.msra.mxu1 %v282_v6  ;;  %115 = vmatpush1.bf16.msra.mxu0 %v283_v7  ;;  %v67_v15 = vrot.slane %v54_v12, %v66_v11  ;;  %v59_v16 = vrot.slane %v54_v12, %v58_v13  ;;  %v63_v17 = vrot.slane %v54_v12, %v62_v14 }
  0x2f   :  { %p336_p5 = por %p335_p4, %p334_p3 }
  0x31   :  { %263 = vmatmul.mubr.msk.bf16.vlgmr.msra.gmra.mrb[0].mxu1 %vm108_vm1, %v284_v8  ;;  %245 = vmatmul.mubr.msk.bf16.vlgmr.msra.gmra.mrb[0].mxu0 %vm108_vm1, %v284_v8  ;;  %p337_p6 = pnand %p336_p5, %p330_p2 }
 0x104   :  { %v189_v18 = vpop.f32.mrb[0].mxu1  ;;  %v146_v20 = vpop.f32.mrb[0].mxu0 }
 0x105   :  { %v190_v19 = vadd.f32 %v189_v18, %v67_v15  ;;  %v264_v21 = vpop.f32.mrb[1].mxu1  ;;  %v147_v22 = vadd.f32 %v146_v20, %v59_v16  ;;  %v148_v23 = vpop.f32.mrb[1].mxu0 }
 0x106   :  { %v192_v24 = vpop.f32.mrb[2].mxu1  ;;  %v149_v26 = vadd.f32 %v148_v23, %v63_v17  ;;  %v150_v28 = vpop.f32.mrb[2].mxu0 }
 0x107   :  { %v252_v25 = vpack.c.bf16 %v190_v19, %v190_v19  ;;  %v193_v27 = vadd.f32 %v192_v24, %v67_v15  ;;  %v265_v29 = vpop.f32.mrb[3].mxu1  ;;  %v151_v30 = vadd.f32 %v150_v28, %v59_v16  ;;  %v152_v31 = vpop.f32.mrb[3].mxu0 }
 0x108   :  { %v251_v32 = vpack.c.bf16 %v149_v26, %v147_v22  ;;  %v153_v34 = vadd.f32 %v152_v31, %v63_v17 }
 0x109   :  { %217 = vst [vmem:[#allocation7 + $0x8] sm:$0xf] %v252_v25  ;;  %v254_v33 = vpack.c.bf16 %v193_v27, %v193_v27 }
 0x10a   :  { %216 = vst [vmem:[#allocation7] sm:$0xff] %v251_v32  ;;  %v253_v35 = vpack.c.bf16 %v153_v34, %v151_v30 }
 0x10b   :  { %219 = vst [vmem:[#allocation7 + $0x14] sm:$0xf] %v254_v33 }
 0x10c   :  { %218 = vst [vmem:[#allocation7 + $0xc] sm:$0xff] %v253_v35 }
 0x10d   :  { %340 = shalt.err (!%p337_p6)
}
 0x10e   :  { %s341_s17 = scalar_lea.hbm %s435_s3, 384 }
 0x10f   :  { %p342_p7 = scmp.ne.s32.totalorder %s435_s3, %s341_s17  ;;  %p345_p8 = scmp.lt.u32.totalorder %s341_s17, %s435_s3 }
 0x111   :  { %p347_p9 = pnand %p345_p8, %p342_p7 }
 0x113   :  { %350 = shalt.err (!%p347_p9)
}
 0x114   :  { %231 = dma.vmem_to_hbm [thread:$0]  %s226_s13, 384, %s435_s3, [#allocation4], %s361_s0, %s361_s0, %s362_s9  }
 0x115   :  { %355 = dma.done.wait [#allocation4], 384  }
 0x116   :  { %356 = vsyncadd [#allocation4], 4294966912 }
 0x117   :  { %235 = vsyncpa [#allocation3], 1 }
 0x118   :  { %236 = vsyncpa [#allocation6], 1 }
 0x119   :  { %237 = vsyncpa [#allocation4], 1 }

</bundles_post_ra>
